<compile_context>
chip_gen: v5e
topology: v5e:2x2
jax: 0.10.0
libtpu: 0.0.40
codegen_flags: <defaults>
</compile_context>

<pallas_src>
import functools
import math

import jax
import jax.numpy as jnp
from jax import lax
from jax.experimental import pallas as pl
from jax.experimental.pallas import tpu as pltpu


def _sdpa_kernel(q_ref, k_ref, v_ref, ctx_ref, attn_ref, *, scale):
    # Block shapes: q (1, tq, Dk), k (1, Lk, Dk), v (1, Lk, Dv),
    #               ctx (1, tq, Dv), attn (1, tq, Lk).
    q = q_ref[0] * scale          # scale Lq*Dk elements instead of Lq*Lk scores
    k = k_ref[0]
    v = v_ref[0]

    # scores = (Q * scale) @ K^T — contract last dims of both operands so the
    # MXU consumes K in place (no XLU transpose / extra VMEM copy).
    scores = lax.dot_general(
        q, k, (((1,), (1,)), ((), ())), preferred_element_type=jnp.float32
    )                                                   # (tq, Lk) f32

    # Numerically stable softmax over the key axis.
    m = jnp.max(scores, axis=-1, keepdims=True)
    e = jnp.exp(scores - m)
    denom = jnp.sum(e, axis=-1, keepdims=True)
    r = pl.reciprocal(denom, approx=True)               # EUP slot (cheap)
    r = r * (2.0 - denom * r)                           # one Newton step -> f32 accuracy
    attn = e * r                                        # (tq, Lk) f32

    # context = attn @ V (probabilities cast to V's dtype for the MXU fast path).
    ctx = jnp.dot(attn.astype(v.dtype), v, preferred_element_type=jnp.float32)

    attn_ref[0] = attn.astype(attn_ref.dtype)
    ctx_ref[0] = ctx.astype(ctx_ref.dtype)


def _vmem_budget_bytes():
    try:
        cap = pltpu.get_tpu_info().vmem_capacity_bytes
    except Exception:
        cap = 64 * 1024 * 1024      # conservative fallback (v7x physical per TC)
    return int(cap * 0.75)


def _pick_tq(Lq, Lk, Dk, Dv, itemsize, vmem_budget):
    cands = [c for c in (512, 256, 128, 64, 32, 16, 8) if Lq % c == 0]
    if not cands:
        return Lq                   # tiny / odd Lq: one block spans the whole axis
    for tq in cands:
        # double-buffered working set: Q, K, V input blocks + ctx, attn output blocks
        blk = (tq * Dk + Lk * Dk + Lk * Dv + tq * Dv + tq * Lk) * itemsize
        if 2 * blk <= vmem_budget:
            return tq
    return cands[-1]


def scaled_dot_product_attention(Q, K, V, attn_mask=None):
    if attn_mask is not None:
        raise NotImplementedError("attn_mask path not implemented (see TODO)")

    B, H, Lq, Dk = Q.shape
    _, _, Lk, _ = K.shape
    Dv = V.shape[-1]
    BH = B * H

    # Fuse batch and heads into one grid axis (free reshape of leading dims).
    q = Q.reshape(BH, Lq, Dk)
    k = K.reshape(BH, Lk, Dk)
    v = V.reshape(BH, Lk, Dv)

    vmem_budget = _vmem_budget_bytes()
    tq = _pick_tq(Lq, Lk, Dk, Dv, jnp.dtype(Q.dtype).itemsize, vmem_budget)
    scale = 1.0 / math.sqrt(Lk)     # matches torch: / sqrt(K.shape[-2])

    kernel = functools.partial(_sdpa_kernel, scale=scale)
    ctx, attn = pl.pallas_call(
        kernel,
        out_shape=(
            jax.ShapeDtypeStruct((BH, Lq, Dv), Q.dtype),   # context
            jax.ShapeDtypeStruct((BH, Lq, Lk), Q.dtype),   # attn, in input dtype
        ),
        grid_spec=pltpu.PrefetchScalarGridSpec(
            num_scalar_prefetch=0,
            grid=(BH, Lq // tq),
            in_specs=[
                pl.BlockSpec((1, tq, Dk), lambda b, i: (b, i, 0)),
                pl.BlockSpec((1, Lk, Dk), lambda b, i: (b, 0, 0)),  # same K block for all q tiles
                pl.BlockSpec((1, Lk, Dv), lambda b, i: (b, 0, 0)),  # same V block for all q tiles
            ],
            out_specs=[
                pl.BlockSpec((1, tq, Dv), lambda b, i: (b, i, 0)),
                pl.BlockSpec((1, tq, Lk), lambda b, i: (b, i, 0)),
            ],
        ),
        compiler_params=pltpu.CompilerParams(
            dimension_semantics=("parallel", "parallel"),
            vmem_limit_bytes=vmem_budget,
        ),
    )(q, k, v)

    return ctx.reshape(B, H, Lq, Dv), attn.reshape(B, H, Lq, Lk)


def _reference(Q, K, V):
    d_k = K.shape[-2]   # reference's (unusual) convention: sqrt(len_k)
    scores = jnp.einsum("bhqd,bhkd->bhqk", Q, K) / jnp.sqrt(jnp.float32(d_k))
    attn = jax.nn.softmax(scores, axis=-1)
    context = jnp.einsum("bhqk,bhkv->bhqv", attn, V)
    return context, attn


if __name__ == "__main__":
    B, H, Lq, Lk, Dk, Dv = 2, 4, 8, 8, 32, 32
    key = jax.random.PRNGKey(0)
    kq, kk, kv = jax.random.split(key, 3)
    Q = jax.random.normal(kq, (B, H, Lq, Dk), dtype=jnp.float32)
    K = jax.random.normal(kk, (B, H, Lk, Dk), dtype=jnp.float32)
    V = jax.random.normal(kv, (B, H, Lk, Dv), dtype=jnp.float32)

    ctx, attn = scaled_dot_product_attention(Q, K, V)
    jax.block_until_ready((ctx, attn))

    ctx_ref, attn_ref = _reference(Q, K, V)
    assert jnp.allclose(ctx, ctx_ref, atol=1e-4, rtol=1e-4), \
        float(jnp.max(jnp.abs(ctx - ctx_ref)))
    assert jnp.allclose(attn, attn_ref, atol=1e-4, rtol=1e-4), \
        float(jnp.max(jnp.abs(attn - attn_ref)))

    print("KERNEL_OK")
</pallas_src>

<mosaic_0001>
module attributes {stable_mosaic.version = 11 : i64} {
  func.func @_sdpa_kernel(%arg0: i32, %arg1: i32, %arg2: memref<1x8x32xf32, #tpu.memory_space<vmem>>, %arg3: memref<1x8x32xf32, #tpu.memory_space<vmem>>, %arg4: memref<1x8x32xf32, #tpu.memory_space<vmem>>, %arg5: memref<1x8x32xf32, #tpu.memory_space<vmem>>, %arg6: memref<1x8x8xf32, #tpu.memory_space<vmem>>) attributes {dimension_semantics = [#tpu.dimension_semantics<parallel>, #tpu.dimension_semantics<parallel>], iteration_bounds = array<i64: 8, 1>, scalar_prefetch = 0 : i64, scratch_operands = 0 : i64, tpu.core_type = #tpu.core_type<tc>, window_params = [{transform_indices = @transform_0, window_bounds = array<i64: 1, 8, 32>}, {transform_indices = @transform_1, window_bounds = array<i64: 1, 8, 32>}, {transform_indices = @transform_2, window_bounds = array<i64: 1, 8, 32>}, {transform_indices = @transform_3, window_bounds = array<i64: 1, 8, 32>}, {transform_indices = @transform_4, window_bounds = array<i64: 1, 8, 8>}]} {
    %c0 = arith.constant 0 : index
    %c0_0 = arith.constant 0 : index
    %c0_1 = arith.constant 0 : index
    %0 = vector.load %arg2[%c0, %c0_0, %c0_1] : memref<1x8x32xf32, #tpu.memory_space<vmem>>, vector<1x8x32xf32>
    %1 = vector.shape_cast %0 : vector<1x8x32xf32> to vector<8x32xf32>
    %cst = arith.constant 0.353553385 : f32
    %2 = vector.broadcast %cst : f32 to vector<8x32xf32>
    %3 = arith.mulf %1, %2 : vector<8x32xf32>
    %c0_2 = arith.constant 0 : index
    %c0_3 = arith.constant 0 : index
    %c0_4 = arith.constant 0 : index
    %4 = vector.load %arg3[%c0_2, %c0_3, %c0_4] : memref<1x8x32xf32, #tpu.memory_space<vmem>>, vector<1x8x32xf32>
    %5 = vector.shape_cast %4 : vector<1x8x32xf32> to vector<8x32xf32>
    %c0_5 = arith.constant 0 : index
    %c0_6 = arith.constant 0 : index
    %c0_7 = arith.constant 0 : index
    %6 = vector.load %arg4[%c0_5, %c0_6, %c0_7] : memref<1x8x32xf32, #tpu.memory_space<vmem>>, vector<1x8x32xf32>
    %7 = vector.shape_cast %6 : vector<1x8x32xf32> to vector<8x32xf32>
    %cst_8 = arith.constant dense<0.000000e+00> : vector<8x8xf32>
    %8 = tpu.matmul %3, %5, %cst_8 {dimension_numbers = #tpu.dot_dimension_numbers<[1], [1], [0], [0], [0, 0, 1, 0], [], []>} : vector<8x32xf32>, vector<8x32xf32>, vector<8x8xf32> -> vector<8x8xf32>
    %cst_9 = arith.constant dense<0xFF800000> : vector<8xf32>
    %9 = vector.multi_reduction <maximumf>, %8, %cst_9 [1] : vector<8x8xf32> to vector<8xf32>
    %10 = vector.shape_cast %9 : vector<8xf32> to vector<8x1xf32>
    %11 = vector.broadcast %10 : vector<8x1xf32> to vector<8x8xf32>
    %12 = arith.subf %8, %11 : vector<8x8xf32>
    %13 = math.exp %12 : vector<8x8xf32>
    %cst_10 = arith.constant dense<0.000000e+00> : vector<8xf32>
    %14 = vector.multi_reduction <add>, %13, %cst_10 [1] : vector<8x8xf32> to vector<8xf32>
    %15 = vector.shape_cast %14 : vector<8xf32> to vector<8x1xf32>
    %16 = tpu.reciprocal %15 {approx = true} : vector<8x1xf32> -> vector<8x1xf32>
    %17 = arith.mulf %15, %16 : vector<8x1xf32>
    %cst_11 = arith.constant 2.000000e+00 : f32
    %18 = vector.broadcast %cst_11 : f32 to vector<8x1xf32>
    %19 = arith.subf %18, %17 : vector<8x1xf32>
    %20 = arith.mulf %16, %19 : vector<8x1xf32>
    %21 = vector.broadcast %20 : vector<8x1xf32> to vector<8x8xf32>
    %22 = arith.mulf %13, %21 : vector<8x8xf32>
    %cst_12 = arith.constant dense<0.000000e+00> : vector<8x32xf32>
    %23 = tpu.matmul %22, %7, %cst_12 {dimension_numbers = #tpu.dot_dimension_numbers<[1], [0], [0], [1], [0, 0, 1, 1], [], []>} : vector<8x8xf32>, vector<8x32xf32>, vector<8x32xf32> -> vector<8x32xf32>
    %c0_13 = arith.constant 0 : index
    %c0_14 = arith.constant 0 : index
    %c0_15 = arith.constant 0 : index
    %24 = vector.load %arg6[%c0_13, %c0_14, %c0_15] : memref<1x8x8xf32, #tpu.memory_space<vmem>>, vector<1x8x8xf32>
    %25 = vector.shape_cast %24 : vector<1x8x8xf32> to vector<8x8xf32>
    %26 = vector.shape_cast %22 : vector<8x8xf32> to vector<1x8x8xf32>
    tpu.vector_store %arg6[%c0_13, %c0_14, %c0_15], %26 {strides = array<i32>} : memref<1x8x8xf32, #tpu.memory_space<vmem>>, vector<1x8x8xf32>,
    %c0_16 = arith.constant 0 : index
    %c0_17 = arith.constant 0 : index
    %c0_18 = arith.constant 0 : index
    %27 = vector.load %arg5[%c0_16, %c0_17, %c0_18] : memref<1x8x32xf32, #tpu.memory_space<vmem>>, vector<1x8x32xf32>
    %28 = vector.shape_cast %27 : vector<1x8x32xf32> to vector<8x32xf32>
    %29 = vector.shape_cast %23 : vector<8x32xf32> to vector<1x8x32xf32>
    tpu.vector_store %arg5[%c0_16, %c0_17, %c0_18], %29 {strides = array<i32>} : memref<1x8x32xf32, #tpu.memory_space<vmem>>, vector<1x8x32xf32>,
    return
  }
  func.func @transform_0(%arg0: i32, %arg1: i32) -> (i32, i32, i32) {
    %c0_i32 = arith.constant 0 : i32
    %c0_i32_0 = arith.constant 0 : i32
    return %arg0, %arg1, %c0_i32 : i32, i32, i32
  }
  func.func @transform_1(%arg0: i32, %arg1: i32) -> (i32, i32, i32) {
    %c0_i32 = arith.constant 0 : i32
    %c0_i32_0 = arith.constant 0 : i32
    %c0_i32_1 = arith.constant 0 : i32
    return %arg0, %c0_i32, %c0_i32_0 : i32, i32, i32
  }
  func.func @transform_2(%arg0: i32, %arg1: i32) -> (i32, i32, i32) {
    %c0_i32 = arith.constant 0 : i32
    %c0_i32_0 = arith.constant 0 : i32
    %c0_i32_1 = arith.constant 0 : i32
    return %arg0, %c0_i32, %c0_i32_0 : i32, i32, i32
  }
  func.func @transform_3(%arg0: i32, %arg1: i32) -> (i32, i32, i32) {
    %c0_i32 = arith.constant 0 : i32
    %c0_i32_0 = arith.constant 0 : i32
    return %arg0, %arg1, %c0_i32 : i32, i32, i32
  }
  func.func @transform_4(%arg0: i32, %arg1: i32) -> (i32, i32, i32) {
    %c0_i32 = arith.constant 0 : i32
    %c0_i32_0 = arith.constant 0 : i32
    return %arg0, %arg1, %c0_i32 : i32, i32, i32
  }
}

</mosaic_0001>

<bundles_post_ra>
// kernel: tpu_custom_call.1
= control target key start
LH: loop header
LB: loop body
LE: loop exit
PB: predicated region body
PF: predicated region fallthrough
CT: control target
= control target key end

     0   :  { %s1104_s0 = inlined_call_operand.hbm [shape: f32[8,8,32], index: 0, kind: input, shape index: {}]   ;;  %s1105_s1 = inlined_call_operand.hbm [shape: f32[8,8,32], index: 1, kind: input, shape index: {}]   ;;  %s1106_s2 = inlined_call_operand.hbm [shape: f32[8,8,32], index: 2, kind: input, shape index: {}]   ;;  %s1107_s3 = inlined_call_operand.hbm [shape: f32[8,8,32], index: 3, kind: output, shape index: {0}]   ;;  %s1108_s4 = inlined_call_operand.hbm [shape: f32[8,8,8], index: 4, kind: output, shape index: {1}]  }
   0x1   :  { %1112 = sst [smem:[#allocation19_spill]] %s1105_s1 }
   0x2   :  { %10 = vsyncpa [#allocation3], 0 }
   0x3   :  { %12 = vsyncpa [#allocation3 + $0x1], 0 }
   0x4   :  { %13 = vsyncpa [#allocation6], 0 }
   0x5   :  { %15 = vsyncpa [#allocation6 + $0x1], 0 }
   0x6   :  { %16 = vsyncpa [#allocation4], 0 }
   0x7   :  { %18 = vsyncpa [#allocation4 + $0x1], 0 }
   0x8   :  { %19 = vsyncpa [#allocation10], 0 }
   0x9   :  { %21 = vsyncpa [#allocation10 + $0x1], 0  ;;  %s926_s15 = smov 0   ;;  %s928_s16 = smov 0  }
   0xa   :  { %s930_s17 = smov 0   ;;  %s932_s18 = smov 0  }
   0xb   :  { %s934_s19 = smov 0   ;;  %s936_s20 = smov 0  }
   0xc LB: > { %1113 = sst [smem:[#allocation15_spill]] %s887_s17  ;;  %s957_s21 = sadd.s32 4294967295, %s899_s20   ;;  %s899_s20 = sphi %s936_s20, %s27_s20   ;;  %s895_s19 = sphi %s934_s19, %s1127_s19   ;;  %s891_s18 = sphi %s932_s18, %s1126_s18   ;;  %s887_s17 = sphi %s930_s17, %s1125_s17   ;;  %s883_s16 = sphi %s928_s16, %s1129_s16   ;;  %s879_s15 = sphi %s926_s15, %s1128_s15  }
   0xd   : > { %1114 = sst [smem:[#allocation16_spill]] %s895_s19  ;;  %s586_s22 = sadd.s32 4294967294, %s899_s20  }
   0xe   : > { %s39_s23 = sadd.s32 1, %s895_s19  ;;  %s48_s24 = sadd.s32 1, %s887_s17 }
   0xf   : > { %p41_p0 = scmp.ge.s32.totalorder %s39_s23, 8  ;;  %p55_p1 = scmp.ne.s32.totalorder %s887_s17, %s883_s16 }
  0x10   : > { %p56_p2 = scmp.eq.s32.totalorder %s899_s20, 0  ;;  %p61_p3 = scmp.ne.s32.totalorder %s883_s16, %s879_s15 }
  0x11   : > { %s1131_s23 = smov (%p41_p0, %s39_s23), 0  ;;  %p62_p5 = scmp.eq.s32.totalorder %s957_s21, 0 }
  0x12   : > { %1115 = sst [smem:[#allocation17_spill]] %s1131_s23  ;;  %p969_p4 = por %p56_p2, %p55_p1 }
  0x13   : > { %s43_s26 = ssub.s32 %s895_s19, %s1131_s23  ;;  %p139_p6 = scmp.eq.s32.totalorder %s957_s21, 7 }
  0x14   : > { %p46_p7 = scmp.eq.s32.totalorder %s43_s26, 0  ;;  %p977_p8 = por %p62_p5, %p61_p3 }
  0x15   : > { %p981_p9 = por %p139_p6, %p55_p1  ;;  %p145_p10 = scmp.eq.s32.totalorder %s586_s22, 7 }
  0x16   : > { %s986_s29 = scalar_select %p46_p7, %s887_s17, %s48_s24  }
  0x17   : > { %p988_p11 = por %p145_p10, %p61_p3  ;;  %p637_p12 = scmp.lt.s32.totalorder %s899_s20, 8 }
  0x18   : > { %1119 = sst [smem:[#allocation18_spill]] %s986_s29  ;;  %s193_s5 = sand.u32 1, %s887_s17  }
  0x19   : > { %s589_s6 = sshll.u32 %s193_s5, 3  ;;  %s590_s7 = sshll.u32 %s895_s19, 3 }
  0x1a   : > { %p997_p13 = pnand %p637_p12, %p969_p4  ;;  %s213_s9 = sand.u32 1, %s899_s20  }
  0x1b   : > { %s1122_s1 = sld [smem:[#allocation19_spill]]  ;;  %s217_s14 = scalar_lea.vmem [#allocation5], %s589_s6 }
  0x1c   : > { %s225_s22 = sshll.u32 %s217_s14, 4  ;;  %s214_s24 = scalar_lea.sflag [#allocation6], %s213_s9  ;;  %s226_s22 = int_to_ptr.vmem [resolvable:$true] %s225_s22 }
  0x1d   : > { %p595_p0 = scmp.ge.s32.totalorder %s899_s20, 1  ;;  %p249_p1 = scmp.lt.s32.totalorder %s899_s20, 9 }
  0x1e   : > { %s202_s10 = scalar_lea.hbm %s1104_s0, %s590_s7  ;;  %s194_s14 = scalar_lea.sflag [#allocation3], %s193_s5 }
  0x1f   : > { %p1009_p2 = pnand %p595_p0, %p249_p1  ;;  %s204_s11 = sshll.u32 %s202_s10, 4  ;;  %s205_s11 = int_to_ptr.hbm [resolvable:$true] %s204_s11 }
  0x20   : > { %s236_s29 = scalar_lea.vmem [#allocation7], %s589_s6  ;;  %s1026_s23 = sand.u32 (!%p1009_p2), 1, %s883_s16  }
  0x21   : > { %s221_s12 = scalar_lea.hbm %s1122_s1, %s590_s7  ;;  %s244_s17 = sshll.u32 %s236_s29, 4  ;;  %s245_s17 = int_to_ptr.vmem [resolvable:$true] %s244_s17 }
  0x22   : > { %s223_s13 = sshll.u32 %s221_s12, 4  ;;  %s197_s12 = scalar_lea.vmem [#allocation2], %s589_s6  ;;  %s224_s13 = int_to_ptr.hbm [resolvable:$true] %s223_s13 }
  0x23   : > { %626 = dma.hbm_to_vmem [thread:$0]  (!%p997_p13), %s224_s13, 128, %s226_s22, %s214_s24  }
  0x24   : > { %s206_s1 = sshll.u32 %s197_s12, 4  ;;  %s240_s22 = scalar_lea.hbm %s1106_s2, %s590_s7  ;;  %s207_s1 = int_to_ptr.vmem [resolvable:$true] %s206_s1 }
  0x25   : > { %623 = dma.hbm_to_vmem [thread:$0]  (!%p997_p13), %s205_s11, 128, %s207_s1, %s194_s14  }
  0x26   : > { %s242_s19 = sshll.u32 %s240_s22, 4  ;;  %253 = sbr.rel (%p1009_p2) target bundleno = 566 (0x236), region = 32  ;;  %s243_s19 = int_to_ptr.hbm [resolvable:$true] %s242_s19 }
  0x27   : > { %629 = dma.hbm_to_vmem [thread:$0]  (!%p997_p13), %s243_s19, 128, %s245_s17, %s214_s24  }
  0x28   : > { %s1029_s1 = sshll.u32 (!%p1009_p2), %s1026_s23, 3  ;;  %s256_s5 = scalar_lea.sflag (!%p1009_p2), [#allocation3], %s1026_s23 }
  0x29   : > { %s259_s7 = scalar_lea.vmem (!%p1009_p2), [#allocation2], %s1029_s1 }
  0x2b   : > { %862 = dma.done.wait (%p977_p8), %s256_s5, 128  }
  0x2c   : > { %864 = vsyncadd (%p977_p8), %s256_s5, 4294967168  ;;  %s265_s17 = sand.u32 1, %s957_s21   ;;  %s269_s29 = scalar_lea.vmem [#allocation5], %s1029_s1 }
  0x2d   : > { %s266_s19 = scalar_lea.sflag [#allocation6], %s265_s17 }
  0x2e   : > { %866 = dma.done.wait (%p977_p8), %s266_s19, 256  }
  0x2f   : > { %868 = vsyncadd (%p977_p8), %s266_s19, 4294967040  ;;  %vm324_vm0 = vcmask 261120   ;;  %v322_v0 = vld [vmem:[%s269_s29] sm:$0xff]  ;;  %v320_v1 = vld [vmem:[%s259_s7] sm:$0xff]  ;;  %vm351_vm1 = vcmask 64512   ;;  %s279_s21 = scalar_lea.vmem [#allocation7], %s1029_s1 }
  0x30   : > { %601 = vmatpush.xpose.msk.msra.mxu0 %vm324_vm0, %v322_v0  ;;  %v321_v2 = vmul.f32 0.35355338, %v320_v1  ;;  %v323_v10 = vld [vmem:[%s279_s21] sm:$0xff]  ;;  %s606_s27 = sshll.u32 %s891_s18, 3  ;;  %s319_s25 = scalar_lea.vmem [#allocation9], %s1029_s1 }
  0x31   : > { %384 = vmatpush.msra.mxu1 %v323_v10  ;;  %s423_s24 = scalar_lea.hbm %s1108_s4, %s606_s27  ;;  %s425_s26 = sshll.u32 %s319_s25, 4  ;;  %s426_s26 = int_to_ptr.vmem [resolvable:$true] %s425_s26 }
  0x32   : > { %s427_s10 = sshll.u32 %s423_s24, 4  ;;  %s397_s11 = scalar_lea.sflag [#allocation10], %s1026_s23  ;;  %s428_s10 = int_to_ptr.hbm [resolvable:$true] %s427_s10 }
  0x33   : > { %602 = vmatmul.msk.f32.vlgmr.msra.gmra.mxu0 %vm324_vm0, %v321_v2  ;;  %s795_s12 = sshra.s32 %s428_s10, 4  ;;  %s801_s13 = scalar_lea.hbm %s1108_s4, 64  ;;  %s796_s12 = int_to_ptr.hbm [resolvable:$true] %s795_s12 }
  0x34   : > { %s797_s18 = scalar_lea.hbm %s796_s12, 8  ;;  %p802_p6 = scmp.lt.s32.totalorder %s796_s12, %s1108_s4 }
  0x35   : > { %p798_p3 = scmp.ne.s32.totalorder %s796_s12, %s797_s18  ;;  %p803_p7 = scmp.lt.s32.totalorder %s801_s13, %s797_s18 }
  0x37   : > { %p799_p4 = pnand %p798_p3, %p981_p9  ;;  %p804_p8 = por %p803_p7, %p802_p6 }
  0x39   : > { %p800_p5 = pneg %p799_p4 }
  0x3b   : > { %p805_p10 = pnand %p804_p8, %p800_p5 }
  0xb0   : > { %v348_v3 = vpop.f32.mrf.mxu0 }
  0xb1   : > { %v352_v4 = vsel %vm351_vm1, %v348_v3, -inf }
  0xb2   : > { %353 = vmax.xlane.f32.xlu0 %v352_v4 }
 0x125   : > { %v354_v5 = vpop.xlane.xlu0 %353 }
 0x126   : > { %v355_v6 = vsub.f32 %v348_v3, %v354_v5 }
 0x128   : > { %v356_v7 = vmul.f32 1.442695, %v355_v6 }
 0x12a   : > { %687 = vpow2.f32 %v356_v7 }
 0x130   : > { %v688_v8 = vpop.eup %687 }
 0x131   : > { %v358_v9 = vsel %vm351_vm1, %v688_v8, 0.0 }
 0x132   : > { %359 = vadd.xlane.f32.xlu0 %v358_v9 }
 0x1a5   : > { %v360_v11 = vpop.xlane.xlu0 %359 }
 0x1a6   : > { %689 = vrcp.f32 %v360_v11 }
 0x1ac   : > { %v690_v12 = vpop.eup %689 }
 0x1ad   : > { %v362_v13 = vmul.f32 %v690_v12, %v360_v11 }
 0x1af   : > { %v363_v14 = vsub.f32 2.0, %v362_v13 }
 0x1b1   : > { %v364_v15 = vmul.f32 %v690_v12, %v363_v14 }
 0x1b3   : > { %v365_v16 = vmul.f32 %v688_v8, %v364_v15 }
 0x1b5   : > { %603 = vmatmul.msk.f32.vlgmr.msra.gmra.mxu1 %vm351_vm1, %v365_v16  ;;  %389 = vst.msk [vmem:[%s319_s25] sm:$0xff] %vm351_vm1, %v365_v16 }
 0x1b6   : > { %808 = shalt.err (!%p805_p10)
}
 0x1b7   : > { %617 = dma.vmem_to_hbm [thread:$0]  (%p981_p9), %s426_s26, 128, %s428_s10, %s397_s11  }
 0x1b8   : > { %s408_s19 = scalar_lea.hbm %s1107_s3, %s606_s27  ;;  %s312_s29 = scalar_lea.vmem [#allocation8], %s1029_s1 }
 0x1b9   : > { %s410_s21 = sshll.u32 %s312_s29, 4  ;;  %s412_s6 = sshll.u32 %s408_s19, 4  ;;  %s411_s21 = int_to_ptr.vmem [resolvable:$true] %s410_s21  ;;  %s413_s6 = int_to_ptr.hbm [resolvable:$true] %s412_s6 }
 0x1ba   : > { %s392_s8 = scalar_lea.sflag [#allocation4], %s1026_s23  ;;  %s823_s24 = sshra.s32 %s413_s6, 4  ;;  %s824_s24 = int_to_ptr.hbm [resolvable:$true] %s823_s24 }
 0x1bb   : > { %s825_s25 = scalar_lea.hbm %s824_s24, 8  ;;  %s829_s27 = scalar_lea.hbm %s1107_s3, 64 }
 0x1bc   : > { %p826_p12 = scmp.ne.s32.totalorder %s824_s24, %s825_s25  ;;  %p830_p1 = scmp.lt.s32.totalorder %s824_s24, %s1107_s3 }
 0x1bd   : > { %p831_p2 = scmp.lt.s32.totalorder %s829_s27, %s825_s25 }
 0x1be   : > { %p827_p13 = pnand %p826_p12, %p981_p9 }
 0x1bf   : > { %p832_p3 = por %p831_p2, %p830_p1 }
 0x1c0   : > { %p828_p0 = pneg %p827_p13 }
 0x1c2   : > { %p833_p4 = pnand %p832_p3, %p828_p0 }
 0x232   : > { %v386_v17 = vpop.f32.mrf.mxu1 }
 0x233   : > { %390 = vst.msk [vmem:[%s312_s29] sm:$0xff] %vm324_vm0, %v386_v17 }
 0x234   : > { %836 = shalt.err (!%p833_p4)
}
 0x235   : > { %616 = dma.vmem_to_hbm [thread:$0]  (%p981_p9), %s411_s21, 128, %s413_s6, %s392_s8  }
 0x236 PF: > { %p638_p5 = scmp.ge.s32.totalorder %s899_s20, 2  ;;  %s439_s23 = sand.u32 1, %s879_s15  }
 0x237   : > { %s440_s12 = scalar_lea.sflag [#allocation4], %s439_s23 }
 0x238   : > { %p631_p6 = pnand %p638_p5, %p988_p11 }
 0x23a   : > { %p632_p7 = pneg %p631_p6 }
 0x23c   : > { %870 = dma.done.wait (%p632_p7), %s440_s12, 128  }
 0x23d   : > { %872 = vsyncadd (%p632_p7), %s440_s12, 4294967168  ;;  %s450_s18 = scalar_lea.sflag [#allocation10], %s439_s23 }
 0x23e   : > { %874 = dma.done.wait (%p632_p7), %s450_s18, 128  }
 0x23f   : > { %876 = vsyncadd (%p632_p7), %s450_s18, 4294967168  ;;  %s27_s20 = sadd.s32 1, %s899_s20   ;;  %s1124_s28 = sld [smem:[#allocation15_spill]] }
 0x240   : > { %p24_p8 = scmp.ge.s32.totalorder %s27_s20, 10   ;;  %s1125_s17 = sld [smem:[#allocation18_spill]] }
 0x241   : > { %s1126_s18 = sld [smem:[#allocation16_spill]]  ;;  %s1128_s15 = smov %s883_s16 }
 0x242   : > { %s1127_s19 = sld [smem:[#allocation17_spill]]  ;;  %26 = sbr.rel (!%p24_p8) target bundleno = 12 (0xc), region = 118 }
 0x245   : > { %s1129_s16 = smov %s1124_s28 }
 0x247   :  { %456 = vsyncpa [#allocation3], 1 }
 0x248   :  { %458 = vsyncpa [#allocation3 + $0x1], 1 }
 0x249   :  { %459 = vsyncpa [#allocation6], 1 }
 0x24a   :  { %461 = vsyncpa [#allocation6 + $0x1], 1 }
 0x24b   :  { %462 = vsyncpa [#allocation4], 1 }
 0x24c   :  { %464 = vsyncpa [#allocation4 + $0x1], 1 }
 0x24d   :  { %465 = vsyncpa [#allocation10], 1 }
 0x24e   :  { %467 = vsyncpa [#allocation10 + $0x1], 1 }

</bundles_post_ra>
